<compile_context>
chip_gen: v7x
topology: tpu7x:2x2x1
jax: 0.10.0
libtpu: 0.0.40
codegen_flags: <defaults>
</compile_context>

<pallas_src>
import math

import jax
import jax.numpy as jnp
from jax.experimental import pallas as pl
from jax.experimental.pallas import tpu as pltpu


# ---------------------------------------------------------------------------
# Kernel
# ---------------------------------------------------------------------------
def _ggnn_kernel(a_ref, h_aug_ref, w_ref, out_ref):
    f32 = jnp.float32
    bf16 = jnp.bfloat16
    tb, L, Hp1 = h_aug_ref.shape
    H = Hp1 - 1

    h_aug = h_aug_ref[...]                       # (tb, L, H+1) f32, [hidden | 1]
    hidden = h_aug[:, :, :H]                     # exact f32 hidden

    if L <= 16:
        # Adjacency aggregation on the VPU: L broadcast-FMA passes over the
        # resident block.  Avoids tb tiny (L,L)@(L,H) MXU pushes (drain-latency
        # bound at <5% utilization) and keeps the MXU free for the gate matmul.
        a = a_ref[...].astype(f32)               # (tb, L, 2L)
        h0 = h_aug[:, 0:1, :]
        ah_in = a[:, :, 0:1] * h0
        ah_out = a[:, :, L:L + 1] * h0
        for j in range(1, L):
            hj = h_aug[:, j:j + 1, :]
            ah_in = ah_in + a[:, :, j:j + 1] * hj
            ah_out = ah_out + a[:, :, L + j:L + j + 1] * hj
    else:
        # Larger graphs: batched bf16 matmuls on the MXU.
        a = a_ref[...]                           # bf16 (tb, L, 2L)
        h_bf = h_aug.astype(bf16)
        ah_in = jnp.einsum("bij,bjh->bih", a[:, :, :L], h_bf,
                           preferred_element_type=f32)
        ah_out = jnp.einsum("bij,bjh->bih", a[:, :, L:], h_bf,
                            preferred_element_type=f32)

    # Single fused gate matmul: X (tb*L, 3H+3) @ W_comb (3H+3, 4H).
    # The ones-column of h_aug makes A@h_aug carry rowsum(A), so the rowsum
    # and constant-bias rows of W_comb add every edge/gate bias on the MXU.
    x = jnp.concatenate([ah_in, ah_out, h_aug], axis=-1)        # (tb, L, 3H+3)
    x2 = x.reshape(tb * L, 3 * Hp1).astype(bf16)
    g = jnp.dot(x2, w_ref[...], preferred_element_type=f32)     # (tb*L, 4H)
    g = g.reshape(tb, L, 4 * H)

    # Column groups of g: [i_r+h_r | i_i+h_i | i_n | h_n].
    r = jax.nn.sigmoid(g[..., :H])                               # reset gate
    z = jax.nn.sigmoid(g[..., H:2 * H])                          # update gate
    n = jnp.tanh(r * g[..., 3 * H:] + g[..., 2 * H:3 * H])       # candidate
    h_new = (1.0 - z) * hidden + z * n

    # F.normalize(p=2, dim=-1, eps=1e-12) followed by the residual add.
    ss = jnp.sum(h_new * h_new, axis=-1, keepdims=True)
    inv = jax.lax.rsqrt(jnp.maximum(ss, 1e-24))                  # = 1/max(||x||,1e-12)
    out_ref[...] = (hidden + h_new * inv).astype(out_ref.dtype)


# ---------------------------------------------------------------------------
# Host-side weight folding
# ---------------------------------------------------------------------------
def _fold_weights(H, wi, bi, wh, bh, w_in, b_in, w_out, b_out, b_iah, b_oah):
    """Fold the edge linears, wi, wh and all biases into one (3H+3, 4H) matrix.

    Row order matches X = [A_in@h | rs_in | A_out@h | rs_out | h | 1];
    column groups are [i_r+h_r | i_i+h_i | i_n | h_n].
    """
    f32 = jnp.float32
    wi, bi, wh, bh = (t.astype(f32) for t in (wi, bi, wh, bh))
    w_in, b_in, w_out, b_out = (t.astype(f32) for t in (w_in, b_in, w_out, b_out))
    b_iah, b_oah = b_iah.astype(f32), b_oah.astype(f32)

    wi_in, wi_out = wi[:, :H], wi[:, H:]                 # (3H, H) each
    m_in = (wi_in @ w_in).T                              # (H, 3H)  Win  ∘ wi_in
    m_out = (wi_out @ w_out).T                           # (H, 3H)  Wout ∘ wi_out
    wh_t = wh.T                                          # (H, 3H)
    c_in = wi_in @ b_in                                  # (3H,)
    c_out = wi_out @ b_out                               # (3H,)
    d = wi_in @ b_iah + wi_out @ b_oah + bi              # (3H,)

    def s3(x):
        return x[..., :H], x[..., H:2 * H], x[..., 2 * H:]

    mi_r, mi_i, mi_n = s3(m_in)
    mo_r, mo_i, mo_n = s3(m_out)
    wh_r, wh_i, wh_n = s3(wh_t)
    ci_r, ci_i, ci_n = s3(c_in[None, :])
    co_r, co_i, co_n = s3(c_out[None, :])
    d_r, d_i, d_n = s3(d[None, :])
    bh_r, bh_i, bh_n = s3(bh[None, :])

    zHH = jnp.zeros((H, H), f32)
    zH = jnp.zeros((1, H), f32)

    w_comb = jnp.concatenate([
        jnp.concatenate([mi_r, mi_i, mi_n, zHH], axis=1),              # A_in@h rows
        jnp.concatenate([ci_r, ci_i, ci_n, zH], axis=1),               # rowsum(A_in)
        jnp.concatenate([mo_r, mo_i, mo_n, zHH], axis=1),              # A_out@h rows
        jnp.concatenate([co_r, co_i, co_n, zH], axis=1),               # rowsum(A_out)
        jnp.concatenate([wh_r, wh_i, zHH, wh_n], axis=1),              # hidden rows
        jnp.concatenate([d_r + bh_r, d_i + bh_i, d_n, bh_n], axis=1),  # constant row
    ], axis=0)                                                         # (3H+3, 4H)
    return w_comb


# ---------------------------------------------------------------------------
# Batch-block sizing from the VMEM budget
# ---------------------------------------------------------------------------
def _round_up(x, m):
    return (x + m - 1) // m * m


def _per_item_vmem_bytes(L, H):
    """Rough per-batch-item VMEM footprint of one grid step (padded tiles)."""
    Lr = _round_up(L, 8)
    a = Lr * _round_up(2 * L, 128) * 2 * 2          # bf16 A block, double-buffered
    h = Lr * _round_up(H + 1, 128) * 4 * 2          # f32 [h|1] block, double-buffered
    o = Lr * _round_up(H, 128) * 4 * 2              # f32 out block, double-buffered
    scratch = Lr * (4 * _round_up(H + 1, 128)       # ah_in/ah_out/x pieces
                    + _round_up(3 * H + 3, 128)     # x2
                    + _round_up(4 * H, 128)         # g
                    + 6 * _round_up(H, 128)) * 4    # gates / h_new / out
    return a + h + o + scratch


def _pick_tb(batch, per_item_bytes, vmem_budget, seq):
    """Largest divisor of batch fitting the budget; prefer >=2 grid steps so the
    ("parallel",) batch axis can shard across both v7x TensorCores, as long as
    each step still has a reasonable number of MXU rows."""
    divisors = [d for d in range(1, batch + 1) if batch % d == 0]
    fitting = [d for d in divisors if d * per_item_bytes <= vmem_budget] or [1]
    tb = max(fitting)
    if batch // tb < 2:
        smaller = [d for d in fitting if d < tb and (d * seq >= 128 or batch <= 8)]
        if smaller:
            tb = max(smaller)
    return tb


# ---------------------------------------------------------------------------
# Wrapper
# ---------------------------------------------------------------------------
def ggnn_forward(A, hidden, wi, bi, wh, bh, w_in, b_in, w_out, b_out,
                 b_iah, b_oah, tb=None):
    """A: (B, L, 2L) adjacency (in-edges | out-edges); hidden: (B, L, H).
    Weights follow the PyTorch parameter shapes. Returns new hidden (B, L, H)."""
    B, L, H = hidden.shape
    assert A.shape == (B, L, 2 * L)
    f32 = jnp.float32
    bf16 = jnp.bfloat16

    hidden = hidden.astype(f32)
    # Hidden augmented with a ones column: A @ [h | 1] = [A@h | rowsum(A)].
    h_aug = jnp.concatenate([hidden, jnp.ones((B, L, 1), f32)], axis=-1)
    a_bf = A.astype(bf16)                              # MXU-native, halves A traffic

    w_comb = _fold_weights(H, wi, bi, wh, bh, w_in, b_in, w_out, b_out,
                           b_iah, b_oah).astype(bf16)  # (3H+3, 4H)

    try:
        vmem_cap = int(pltpu.get_tpu_info().vmem_capacity_bytes)
    except Exception:                                  # fallback: v7x-sized budget
        vmem_cap = 64 * 1024 * 1024
    per_item = _per_item_vmem_bytes(L, H)
    if tb is None:
        tb = _pick_tb(B, per_item, int(vmem_cap * 0.55), L)
    assert B % tb == 0
    grid = (B // tb,)

    compiler_kwargs = dict(dimension_semantics=("parallel",))
    need = tb * per_item + w_comb.size * 2 + (1 << 20)
    if need > (16 << 20):          # only raise the scoped limit when necessary
        compiler_kwargs["vmem_limit_bytes"] = min(int(vmem_cap * 0.7),
                                                  max(2 * need, 32 << 20))

    out = pl.pallas_call(
        _ggnn_kernel,
        grid_spec=pltpu.PrefetchScalarGridSpec(
            num_scalar_prefetch=0,
            grid=grid,
            in_specs=[
                pl.BlockSpec((tb, L, 2 * L), lambda i: (i, 0, 0)),   # A (in | out)
                pl.BlockSpec((tb, L, H + 1), lambda i: (i, 0, 0)),   # [hidden | 1]
                pl.BlockSpec((3 * H + 3, 4 * H), lambda i: (0, 0)),  # fused weights
            ],
            out_specs=pl.BlockSpec((tb, L, H), lambda i: (i, 0, 0)),
        ),
        out_shape=jax.ShapeDtypeStruct((B, L, H), f32),
        compiler_params=pltpu.CompilerParams(**compiler_kwargs),
    )(a_bf, h_aug, w_comb)
    return out


# ---------------------------------------------------------------------------
# Pure-JAX reference (mirrors the PyTorch module, all f32)
# ---------------------------------------------------------------------------
def ggnn_reference(A, hidden, wi, bi, wh, bh, w_in, b_in, w_out, b_out,
                   b_iah, b_oah):
    L = A.shape[1]
    input_in = jnp.matmul(A[:, :, :L], hidden @ w_in.T + b_in) + b_iah
    input_out = jnp.matmul(A[:, :, L:], hidden @ w_out.T + b_out) + b_oah
    input_emb = jnp.concatenate([input_in, input_out], axis=2)
    gi = input_emb @ wi.T + bi
    gh = hidden @ wh.T + bh
    i_r, i_i, i_n = jnp.split(gi, 3, axis=2)
    h_r, h_i, h_n = jnp.split(gh, 3, axis=2)
    z = jax.nn.sigmoid(i_i + h_i)
    r = jax.nn.sigmoid(i_r + h_r)
    n = jnp.tanh(r * h_n + i_n)
    h_new = (1.0 - z) * hidden + z * n
    norm = jnp.maximum(jnp.sqrt(jnp.sum(h_new * h_new, axis=-1, keepdims=True)),
                       1e-12)
    return hidden + h_new / norm


if __name__ == "__main__":
    B, L, H = 2, 8, 32

    key = jax.random.PRNGKey(0)
    keys = jax.random.split(key, 12)
    bound = 1.0 / math.sqrt(H)

    def u(k, shape):
        return jax.random.uniform(k, shape, jnp.float32, -bound, bound)

    hidden = jax.random.normal(keys[0], (B, L, H), dtype=jnp.float32)
    # adjacency: in-edge half | out-edge half, degree-normalized-style values
    A = jax.random.uniform(keys[1], (B, L, 2 * L), dtype=jnp.float32)

    wi = u(keys[2], (3 * H, 2 * H))
    bi = u(keys[3], (3 * H,))
    wh = u(keys[4], (3 * H, H))
    bh = u(keys[5], (3 * H,))
    w_in = u(keys[6], (H, H))
    b_in = u(keys[7], (H,))
    w_out = u(keys[8], (H, H))
    b_out = u(keys[9], (H,))
    b_iah = u(keys[10], (H,))
    b_oah = u(keys[11], (H,))

    out = ggnn_forward(A, hidden, wi, bi, wh, bh, w_in, b_in, w_out, b_out,
                       b_iah, b_oah)
    jax.block_until_ready(out)

    ref = ggnn_reference(A, hidden, wi, bi, wh, bh, w_in, b_in, w_out, b_out,
                         b_iah, b_oah)

    assert out.shape == (B, L, H)
    max_err = float(jnp.max(jnp.abs(out - ref)))
    # Tolerance accounts for bf16 matmul operands (f32 accumulation/epilogue).
    assert jnp.allclose(out, ref, atol=3e-2, rtol=3e-2), max_err
    print("KERNEL_OK")
</pallas_src>

<mosaic_0001>
module attributes {stable_mosaic.version = 11 : i64} {
  func.func @_ggnn_kernel(%arg0: i32, %arg1: memref<1x8x16xbf16, #tpu.memory_space<vmem>>, %arg2: memref<1x8x33xf32, #tpu.memory_space<vmem>>, %arg3: memref<99x128xbf16, #tpu.memory_space<vmem>>, %arg4: memref<1x8x32xf32, #tpu.memory_space<vmem>>) attributes {dimension_semantics = [#tpu.dimension_semantics<parallel>], iteration_bounds = array<i64: 2>, scalar_prefetch = 0 : i64, scratch_operands = 0 : i64, tpu.core_type = #tpu.core_type<tc>, window_params = [{transform_indices = @transform_0, window_bounds = array<i64: 1, 8, 16>}, {transform_indices = @transform_1, window_bounds = array<i64: 1, 8, 33>}, {pipeline_mode = #tpu.pipeline_mode<synchronous>, transform_indices = @transform_2, window_bounds = array<i64: 99, 128>}, {transform_indices = @transform_3, window_bounds = array<i64: 1, 8, 32>}]} {
    %c0 = arith.constant 0 : index
    %c0_0 = arith.constant 0 : index
    %c0_1 = arith.constant 0 : index
    %0 = vector.load %arg2[%c0, %c0_0, %c0_1] : memref<1x8x33xf32, #tpu.memory_space<vmem>>, vector<1x8x33xf32>
    %1 = vector.extract_strided_slice %0 {offsets = [0, 0, 0], sizes = [1, 8, 32], strides = [1, 1, 1]} : vector<1x8x33xf32> to vector<1x8x32xf32>
    %c0_2 = arith.constant 0 : index
    %c0_3 = arith.constant 0 : index
    %c0_4 = arith.constant 0 : index
    %2 = vector.load %arg1[%c0_2, %c0_3, %c0_4] : memref<1x8x16xbf16, #tpu.memory_space<vmem>>, vector<1x8x16xbf16>
    %3 = arith.extf %2 : vector<1x8x16xbf16> to vector<1x8x16xf32>
    %4 = vector.extract_strided_slice %0 {offsets = [0, 0, 0], sizes = [1, 1, 33], strides = [1, 1, 1]} : vector<1x8x33xf32> to vector<1x1x33xf32>
    %5 = vector.extract_strided_slice %3 {offsets = [0, 0, 0], sizes = [1, 8, 1], strides = [1, 1, 1]} : vector<1x8x16xf32> to vector<1x8x1xf32>
    %6 = vector.broadcast %5 : vector<1x8x1xf32> to vector<1x8x33xf32>
    %7 = vector.broadcast %4 : vector<1x1x33xf32> to vector<1x8x33xf32>
    %8 = arith.mulf %6, %7 : vector<1x8x33xf32>
    %9 = vector.extract_strided_slice %3 {offsets = [0, 0, 8], sizes = [1, 8, 1], strides = [1, 1, 1]} : vector<1x8x16xf32> to vector<1x8x1xf32>
    %10 = vector.broadcast %9 : vector<1x8x1xf32> to vector<1x8x33xf32>
    %11 = vector.broadcast %4 : vector<1x1x33xf32> to vector<1x8x33xf32>
    %12 = arith.mulf %10, %11 : vector<1x8x33xf32>
    %13 = vector.extract_strided_slice %0 {offsets = [0, 1, 0], sizes = [1, 1, 33], strides = [1, 1, 1]} : vector<1x8x33xf32> to vector<1x1x33xf32>
    %14 = vector.extract_strided_slice %3 {offsets = [0, 0, 1], sizes = [1, 8, 1], strides = [1, 1, 1]} : vector<1x8x16xf32> to vector<1x8x1xf32>
    %15 = vector.broadcast %14 : vector<1x8x1xf32> to vector<1x8x33xf32>
    %16 = vector.broadcast %13 : vector<1x1x33xf32> to vector<1x8x33xf32>
    %17 = arith.mulf %15, %16 : vector<1x8x33xf32>
    %18 = arith.addf %8, %17 : vector<1x8x33xf32>
    %19 = vector.extract_strided_slice %3 {offsets = [0, 0, 9], sizes = [1, 8, 1], strides = [1, 1, 1]} : vector<1x8x16xf32> to vector<1x8x1xf32>
    %20 = vector.broadcast %19 : vector<1x8x1xf32> to vector<1x8x33xf32>
    %21 = vector.broadcast %13 : vector<1x1x33xf32> to vector<1x8x33xf32>
    %22 = arith.mulf %20, %21 : vector<1x8x33xf32>
    %23 = arith.addf %12, %22 : vector<1x8x33xf32>
    %24 = vector.extract_strided_slice %0 {offsets = [0, 2, 0], sizes = [1, 1, 33], strides = [1, 1, 1]} : vector<1x8x33xf32> to vector<1x1x33xf32>
    %25 = vector.extract_strided_slice %3 {offsets = [0, 0, 2], sizes = [1, 8, 1], strides = [1, 1, 1]} : vector<1x8x16xf32> to vector<1x8x1xf32>
    %26 = vector.broadcast %25 : vector<1x8x1xf32> to vector<1x8x33xf32>
    %27 = vector.broadcast %24 : vector<1x1x33xf32> to vector<1x8x33xf32>
    %28 = arith.mulf %26, %27 : vector<1x8x33xf32>
    %29 = arith.addf %18, %28 : vector<1x8x33xf32>
    %30 = vector.extract_strided_slice %3 {offsets = [0, 0, 10], sizes = [1, 8, 1], strides = [1, 1, 1]} : vector<1x8x16xf32> to vector<1x8x1xf32>
    %31 = vector.broadcast %30 : vector<1x8x1xf32> to vector<1x8x33xf32>
    %32 = vector.broadcast %24 : vector<1x1x33xf32> to vector<1x8x33xf32>
    %33 = arith.mulf %31, %32 : vector<1x8x33xf32>
    %34 = arith.addf %23, %33 : vector<1x8x33xf32>
    %35 = vector.extract_strided_slice %0 {offsets = [0, 3, 0], sizes = [1, 1, 33], strides = [1, 1, 1]} : vector<1x8x33xf32> to vector<1x1x33xf32>
    %36 = vector.extract_strided_slice %3 {offsets = [0, 0, 3], sizes = [1, 8, 1], strides = [1, 1, 1]} : vector<1x8x16xf32> to vector<1x8x1xf32>
    %37 = vector.broadcast %36 : vector<1x8x1xf32> to vector<1x8x33xf32>
    %38 = vector.broadcast %35 : vector<1x1x33xf32> to vector<1x8x33xf32>
    %39 = arith.mulf %37, %38 : vector<1x8x33xf32>
    %40 = arith.addf %29, %39 : vector<1x8x33xf32>
    %41 = vector.extract_strided_slice %3 {offsets = [0, 0, 11], sizes = [1, 8, 1], strides = [1, 1, 1]} : vector<1x8x16xf32> to vector<1x8x1xf32>
    %42 = vector.broadcast %41 : vector<1x8x1xf32> to vector<1x8x33xf32>
    %43 = vector.broadcast %35 : vector<1x1x33xf32> to vector<1x8x33xf32>
    %44 = arith.mulf %42, %43 : vector<1x8x33xf32>
    %45 = arith.addf %34, %44 : vector<1x8x33xf32>
    %46 = vector.extract_strided_slice %0 {offsets = [0, 4, 0], sizes = [1, 1, 33], strides = [1, 1, 1]} : vector<1x8x33xf32> to vector<1x1x33xf32>
    %47 = vector.extract_strided_slice %3 {offsets = [0, 0, 4], sizes = [1, 8, 1], strides = [1, 1, 1]} : vector<1x8x16xf32> to vector<1x8x1xf32>
    %48 = vector.broadcast %47 : vector<1x8x1xf32> to vector<1x8x33xf32>
    %49 = vector.broadcast %46 : vector<1x1x33xf32> to vector<1x8x33xf32>
    %50 = arith.mulf %48, %49 : vector<1x8x33xf32>
    %51 = arith.addf %40, %50 : vector<1x8x33xf32>
    %52 = vector.extract_strided_slice %3 {offsets = [0, 0, 12], sizes = [1, 8, 1], strides = [1, 1, 1]} : vector<1x8x16xf32> to vector<1x8x1xf32>
    %53 = vector.broadcast %52 : vector<1x8x1xf32> to vector<1x8x33xf32>
    %54 = vector.broadcast %46 : vector<1x1x33xf32> to vector<1x8x33xf32>
    %55 = arith.mulf %53, %54 : vector<1x8x33xf32>
    %56 = arith.addf %45, %55 : vector<1x8x33xf32>
    %57 = vector.extract_strided_slice %0 {offsets = [0, 5, 0], sizes = [1, 1, 33], strides = [1, 1, 1]} : vector<1x8x33xf32> to vector<1x1x33xf32>
    %58 = vector.extract_strided_slice %3 {offsets = [0, 0, 5], sizes = [1, 8, 1], strides = [1, 1, 1]} : vector<1x8x16xf32> to vector<1x8x1xf32>
    %59 = vector.broadcast %58 : vector<1x8x1xf32> to vector<1x8x33xf32>
    %60 = vector.broadcast %57 : vector<1x1x33xf32> to vector<1x8x33xf32>
    %61 = arith.mulf %59, %60 : vector<1x8x33xf32>
    %62 = arith.addf %51, %61 : vector<1x8x33xf32>
    %63 = vector.extract_strided_slice %3 {offsets = [0, 0, 13], sizes = [1, 8, 1], strides = [1, 1, 1]} : vector<1x8x16xf32> to vector<1x8x1xf32>
    %64 = vector.broadcast %63 : vector<1x8x1xf32> to vector<1x8x33xf32>
    %65 = vector.broadcast %57 : vector<1x1x33xf32> to vector<1x8x33xf32>
    %66 = arith.mulf %64, %65 : vector<1x8x33xf32>
    %67 = arith.addf %56, %66 : vector<1x8x33xf32>
    %68 = vector.extract_strided_slice %0 {offsets = [0, 6, 0], sizes = [1, 1, 33], strides = [1, 1, 1]} : vector<1x8x33xf32> to vector<1x1x33xf32>
    %69 = vector.extract_strided_slice %3 {offsets = [0, 0, 6], sizes = [1, 8, 1], strides = [1, 1, 1]} : vector<1x8x16xf32> to vector<1x8x1xf32>
    %70 = vector.broadcast %69 : vector<1x8x1xf32> to vector<1x8x33xf32>
    %71 = vector.broadcast %68 : vector<1x1x33xf32> to vector<1x8x33xf32>
    %72 = arith.mulf %70, %71 : vector<1x8x33xf32>
    %73 = arith.addf %62, %72 : vector<1x8x33xf32>
    %74 = vector.extract_strided_slice %3 {offsets = [0, 0, 14], sizes = [1, 8, 1], strides = [1, 1, 1]} : vector<1x8x16xf32> to vector<1x8x1xf32>
    %75 = vector.broadcast %74 : vector<1x8x1xf32> to vector<1x8x33xf32>
    %76 = vector.broadcast %68 : vector<1x1x33xf32> to vector<1x8x33xf32>
    %77 = arith.mulf %75, %76 : vector<1x8x33xf32>
    %78 = arith.addf %67, %77 : vector<1x8x33xf32>
    %79 = vector.extract_strided_slice %0 {offsets = [0, 7, 0], sizes = [1, 1, 33], strides = [1, 1, 1]} : vector<1x8x33xf32> to vector<1x1x33xf32>
    %80 = vector.extract_strided_slice %3 {offsets = [0, 0, 7], sizes = [1, 8, 1], strides = [1, 1, 1]} : vector<1x8x16xf32> to vector<1x8x1xf32>
    %81 = vector.broadcast %80 : vector<1x8x1xf32> to vector<1x8x33xf32>
    %82 = vector.broadcast %79 : vector<1x1x33xf32> to vector<1x8x33xf32>
    %83 = arith.mulf %81, %82 : vector<1x8x33xf32>
    %84 = arith.addf %73, %83 : vector<1x8x33xf32>
    %85 = vector.extract_strided_slice %3 {offsets = [0, 0, 15], sizes = [1, 8, 1], strides = [1, 1, 1]} : vector<1x8x16xf32> to vector<1x8x1xf32>
    %86 = vector.broadcast %85 : vector<1x8x1xf32> to vector<1x8x33xf32>
    %87 = vector.broadcast %79 : vector<1x1x33xf32> to vector<1x8x33xf32>
    %88 = arith.mulf %86, %87 : vector<1x8x33xf32>
    %89 = arith.addf %78, %88 : vector<1x8x33xf32>
    %90 = tpu.concatenate %84, %89, %0 in 2 : vector<1x8x33xf32>, vector<1x8x33xf32>, vector<1x8x33xf32> -> vector<1x8x99xf32>
    %91 = vector.shape_cast %90 : vector<1x8x99xf32> to vector<8x99xf32>
    %92 = arith.truncf %91 : vector<8x99xf32> to vector<8x99xbf16>
    %c0_5 = arith.constant 0 : index
    %c0_6 = arith.constant 0 : index
    %93 = vector.load %arg3[%c0_5, %c0_6] : memref<99x128xbf16, #tpu.memory_space<vmem>>, vector<99x128xbf16>
    %cst = arith.constant dense<0.000000e+00> : vector<8x128xf32>
    %94 = tpu.matmul %92, %93, %cst {dimension_numbers = #tpu.dot_dimension_numbers<[1], [0], [0], [1], [0, 0, 1, 1], [], []>} : vector<8x99xbf16>, vector<99x128xbf16>, vector<8x128xf32> -> vector<8x128xf32>
    %95 = vector.shape_cast %94 : vector<8x128xf32> to vector<1x8x128xf32>
    %96 = vector.extract_strided_slice %95 {offsets = [0, 0, 0], sizes = [1, 8, 32], strides = [1, 1, 1]} : vector<1x8x128xf32> to vector<1x8x32xf32>
    %97 = arith.negf %96 : vector<1x8x32xf32>
    %98 = math.exp %97 : vector<1x8x32xf32>
    %cst_7 = arith.constant 1.000000e+00 : f32
    %99 = vector.broadcast %cst_7 : f32 to vector<1x8x32xf32>
    %100 = arith.addf %99, %98 : vector<1x8x32xf32>
    %101 = arith.divf %99, %100 : vector<1x8x32xf32>
    %102 = vector.extract_strided_slice %95 {offsets = [0, 0, 32], sizes = [1, 8, 32], strides = [1, 1, 1]} : vector<1x8x128xf32> to vector<1x8x32xf32>
    %103 = arith.negf %102 : vector<1x8x32xf32>
    %104 = math.exp %103 : vector<1x8x32xf32>
    %cst_8 = arith.constant 1.000000e+00 : f32
    %105 = vector.broadcast %cst_8 : f32 to vector<1x8x32xf32>
    %106 = arith.addf %105, %104 : vector<1x8x32xf32>
    %107 = arith.divf %105, %106 : vector<1x8x32xf32>
    %108 = vector.extract_strided_slice %95 {offsets = [0, 0, 96], sizes = [1, 8, 32], strides = [1, 1, 1]} : vector<1x8x128xf32> to vector<1x8x32xf32>
    %109 = arith.mulf %101, %108 : vector<1x8x32xf32>
    %110 = vector.extract_strided_slice %95 {offsets = [0, 0, 64], sizes = [1, 8, 32], strides = [1, 1, 1]} : vector<1x8x128xf32> to vector<1x8x32xf32>
    %111 = arith.addf %109, %110 : vector<1x8x32xf32>
    %112 = math.tanh %111 : vector<1x8x32xf32>
    %cst_9 = arith.constant 1.000000e+00 : f32
    %113 = vector.broadcast %cst_9 : f32 to vector<1x8x32xf32>
    %114 = arith.subf %113, %107 : vector<1x8x32xf32>
    %115 = arith.mulf %114, %1 : vector<1x8x32xf32>
    %116 = arith.mulf %107, %112 : vector<1x8x32xf32>
    %117 = arith.addf %115, %116 : vector<1x8x32xf32>
    %118 = arith.mulf %117, %117 : vector<1x8x32xf32>
    %cst_10 = arith.constant dense<0.000000e+00> : vector<1x8xf32>
    %119 = vector.multi_reduction <add>, %118, %cst_10 [2] : vector<1x8x32xf32> to vector<1x8xf32>
    %120 = vector.shape_cast %119 : vector<1x8xf32> to vector<1x8x1xf32>
    %cst_11 = arith.constant 1.000000e-24 : f32
    %121 = vector.broadcast %cst_11 : f32 to vector<1x8x1xf32>
    %122 = arith.maximumf %120, %121 : vector<1x8x1xf32>
    %123 = math.rsqrt %122 : vector<1x8x1xf32>
    %124 = vector.broadcast %123 : vector<1x8x1xf32> to vector<1x8x32xf32>
    %125 = arith.mulf %117, %124 : vector<1x8x32xf32>
    %126 = arith.addf %1, %125 : vector<1x8x32xf32>
    %c0_12 = arith.constant 0 : index
    %c0_13 = arith.constant 0 : index
    %c0_14 = arith.constant 0 : index
    %127 = vector.load %arg4[%c0_12, %c0_13, %c0_14] : memref<1x8x32xf32, #tpu.memory_space<vmem>>, vector<1x8x32xf32>
    tpu.vector_store %arg4[%c0_12, %c0_13, %c0_14], %126 {strides = array<i32>} : memref<1x8x32xf32, #tpu.memory_space<vmem>>, vector<1x8x32xf32>,
    return
  }
  func.func @transform_0(%arg0: i32) -> (i32, i32, i32) {
    %c0_i32 = arith.constant 0 : i32
    %c0_i32_0 = arith.constant 0 : i32
    %c0_i32_1 = arith.constant 0 : i32
    return %arg0, %c0_i32, %c0_i32_0 : i32, i32, i32
  }
  func.func @transform_1(%arg0: i32) -> (i32, i32, i32) {
    %c0_i32 = arith.constant 0 : i32
    %c0_i32_0 = arith.constant 0 : i32
    %c0_i32_1 = arith.constant 0 : i32
    return %arg0, %c0_i32, %c0_i32_0 : i32, i32, i32
  }
  func.func @transform_2(%arg0: i32) -> (i32, i32) {
    %c0_i32 = arith.constant 0 : i32
    %c0_i32_0 = arith.constant 0 : i32
    %c0_i32_1 = arith.constant 0 : i32
    return %c0_i32, %c0_i32_0 : i32, i32
  }
  func.func @transform_3(%arg0: i32) -> (i32, i32, i32) {
    %c0_i32 = arith.constant 0 : i32
    %c0_i32_0 = arith.constant 0 : i32
    %c0_i32_1 = arith.constant 0 : i32
    return %arg0, %c0_i32, %c0_i32_0 : i32, i32, i32
  }
}

</mosaic_0001>

<bundles_post_ra>
// kernel: tpu_custom_call.1
= control target key start
LH: loop header
LB: loop body
LE: loop exit
PB: predicated region body
PF: predicated region fallthrough
CT: control target
= control target key end

     0   :  { %8 = vsyncpa [#allocation3], 0  ;;  %s1296_s0 = inlined_call_operand.hbm [shape: bf16[2,8,16], index: 0, kind: input, shape index: {}]   ;;  %s1297_s1 = inlined_call_operand.hbm [shape: f32[2,8,33], index: 1, kind: input, shape index: {}]   ;;  %s1298_s2 = inlined_call_operand.hbm [shape: bf16[99,128], index: 2, kind: input, shape index: {}]   ;;  %s1299_s3 = inlined_call_operand.hbm [shape: f32[2,8,32], index: 3, kind: output, shape index: {}]  }
   0x1   :  { %10 = vsyncpa [#allocation3 + $0x1], 0 }
   0x2   :  { %11 = vsyncpa [#allocation6], 0 }
   0x3   :  { %13 = vsyncpa [#allocation6 + $0x1], 0 }
   0x4   :  { %14 = vsyncpa [#allocation4], 0 }
   0x5   :  { %16 = vsyncpa [#allocation4 + $0x1], 0  ;;  %s1031_s12 = smov 0   ;;  %s1033_s13 = smov 0  }
   0x6   :  { %s1035_s14 = smov 0   ;;  %s1037_s15 = smov 0  }
   0x7 LB: > { %s1052_s16 = sadd.s32 4294967295, %s979_s15   ;;  %s645_s17 = sadd.s32 4294967294, %s979_s15   ;;  %s979_s15 = sphi %s1037_s15, %s1321_s15   ;;  %s975_s14 = sphi %s1035_s14, %s1320_s14   ;;  %s971_s13 = sphi %s1033_s13, %s1319_s13   ;;  %s967_s12 = sphi %s1031_s12, %s1318_s12  }
   0x8   : > { %p42_p0 = scmp.ne.s32.totalorder %s971_s13, %s967_s12  ;;  %p1300_p1 = scmp.eq.s32.totalorder %s1052_s16, 0 }
   0x9   : > { %p119_p3 = scmp.eq.s32.totalorder %s645_s17, 1  ;;  %p646_p5 = scmp.ge.s32.totalorder %s979_s15, 1 }
   0xa   : > { %p1061_p4 = por %p1300_p1, %p42_p0  ;;  %p126_p7 = scmp.lt.s32.totalorder %s979_s15, 3 }
   0xb   : > { %p1066_p6 = por %p119_p3, %p42_p0  ;;  %s981_s21 = smov [#allocation7]  }
   0xc   : > { %s1304_s18 = scalar_select %p1061_p4, 1, 0 }
   0xd   : > { %s1305_s19 = scalar_select %p1066_p6, 1, 0 }
   0xe   : > { %p1071_p8 = pnand %p646_p5, %p126_p7  ;;  %s138_s22 = sshll.u32 %s981_s21, 4  ;;  %s1075_s22 = int_to_ptr.vmem [resolvable:$true] %s138_s22 }
   0xf   : > { %s1087_s24 = sadd.s32 1, %s979_s15   ;;  %s29_s25 = sadd.s32 1, %s975_s14 }
  0x10   : > { %s1306_s20 = scalar_select %p1071_p8, 1, 0 }
  0x11   : > { %p707_p9 = pneg %p1071_p8  ;;  %s26_s26 = ssub.s32 %s979_s15, %s1087_s24 }
  0x12   : > { %s817_s29 = scalar_lea.hbm %s1298_s2, 832 }
  0x13   : > { %p1082_p11 = pnand %p707_p9, %p1300_p1  ;;  %p818_p12 = scmp.ne.s32.totalorder %s1298_s2, %s817_s29 }
  0x14   : > { %p824_p5 = scmp.lt.u32.totalorder %s817_s29, %s1298_s2 }
  0x15   : > { %p819_p13 = pneg %p1082_p11 }
  0x17   : > { %p820_p0 = pnand %p819_p13, %p818_p12 }
  0x19   : > { %p821_p3 = pneg %p820_p0 }
  0x1b   : > { %p826_p7 = pnand %p824_p5, %p821_p3 }
  0x1d   : > { %829 = shalt.err (!%p826_p7)
}
  0x1e   : > { %s830_s7 = scalar_lea.vmem %s1075_s22, 832  ;;  %p838_p2 = scmp.lt.s32.totalorder %s1075_s22, %s1075_s22 }
  0x1f   : > { %p831_p9 = scmp.ne.s32.totalorder %s1075_s22, %s830_s7  ;;  %p839_p6 = scmp.lt.s32.totalorder %s830_s7, %s830_s7 }
  0x21   : > { %p833_p10 = pnand %p831_p9, %p819_p13  ;;  %p840_p4 = por %p839_p6, %p838_p2 }
  0x23   : > { %p834_p1 = pneg %p833_p10 }
  0x25   : > { %p841_p8 = pnand %p840_p4, %p834_p1 }
  0x27   : > { %844 = shalt.err (!%p841_p8)
}
  0x28   : > { %s982_s8 = smov 64   ;;  %s983_s9 = smov 4  }
  0x29   : > { %710 = dma.hbm_to_vmem [thread:$0]  (!%p1082_p11), %s1298_s2, 832, %s1075_s22, [#allocation6], %s982_s8, %s982_s8, %s983_s9  }
  0x2a   : > { %p27_p1 = scmp.eq.s32.totalorder %s26_s26, 0  ;;  %p36_p2 = scmp.ne.s32.totalorder %s975_s14, %s971_s13 }
  0x2b   : > { %p37_p4 = scmp.eq.s32.totalorder %s979_s15, 0  ;;  %p723_p6 = scmp.lt.s32.totalorder %s979_s15, 2 }
  0x2c   : > { %s1118_s17 = scalar_select %p27_p1, %s975_s14, %s29_s25  }
  0x2d   : > { %p38_p8 = por %p37_p4, %p36_p2  ;;  %p1308_p10 = scmp.eq.s32.totalorder %s1052_s16, 1 }
  0x2e   : > { %s1127_s27 = sand.u32 1, %s975_s14   ;;  %s650_s23 = sshll.u32 %s979_s15, 6 }
  0x2f   : > { %p1122_p12 = por %p1308_p10, %p36_p2  ;;  %s649_s28 = sshll.u32 %s1127_s27, 2 }
  0x30   : > { %s1134_s26 = scalar_lea.hbm %s1296_s0, %s650_s23  ;;  %s156_s25 = scalar_lea.vmem [#allocation2], %s649_s28 }
  0x31   : > { %s1309_s21 = scalar_select %p1122_p12, 1, 0 }
  0x32   : > { %s163_s30 = sshll.u32 %s156_s25, 4  ;;  %p1136_p11 = pnand %p723_p6, %p38_p8  ;;  %s1140_s30 = int_to_ptr.vmem [resolvable:$true] %s163_s30 }
  0x33   : > { %s170_s5 = sand.u32 1, %s979_s15   ;;  %s153_s6 = scalar_lea.sflag [#allocation3], %s1127_s27 }
  0x34   : > { %s845_s7 = scalar_lea.hbm %s1134_s26, 64  ;;  %p847_p0 = pneg %p1136_p11 }
  0x35   : > { %p846_p13 = scmp.ne.s32.totalorder %s1134_s26, %s845_s7  ;;  %s850_s10 = scalar_lea.hbm %s1296_s0, 128 }
  0x36   : > { %p851_p7 = scmp.lt.u32.totalorder %s1134_s26, %s1296_s0  ;;  %p852_p9 = scmp.lt.u32.totalorder %s850_s10, %s845_s7 }
  0x37   : > { %p848_p3 = pnand %p847_p0, %p846_p13  ;;  %p854_p2 = scmp.lt.u32.totalorder %s845_s7, %s1134_s26 }
  0x38   : > { %p853_p1 = por %p852_p9, %p851_p7 }
  0x39   : > { %p849_p5 = pneg %p848_p3 }
  0x3a   : > { %p855_p4 = por %p854_p2, %p853_p1 }
  0x3c   : > { %p856_p6 = pnand %p855_p4, %p849_p5 }
  0x3e   : > { %859 = shalt.err (!%p856_p6)
}
  0x3f   : > { %s860_s28 = scalar_lea.vmem %s1140_s30, 64  ;;  %s984_s22 = smov [#allocation2]  }
  0x40   : > { %p861_p8 = scmp.ne.s32.totalorder %s1140_s30, %s860_s28  ;;  %s865_s29 = sshll.u32 %s984_s22, 4  ;;  %s866_s29 = int_to_ptr.vmem [resolvable:$false] %s865_s29 }
  0x41   : > { %s867_s25 = scalar_lea.vmem %s866_s29, 128  ;;  %p868_p3 = scmp.lt.s32.totalorder %s1140_s30, %s866_s29 }
  0x42   : > { %p863_p10 = pnand %p861_p8, %p847_p0  ;;  %p869_p7 = scmp.lt.s32.totalorder %s867_s25, %s860_s28 }
  0x44   : > { %p864_p13 = pneg %p863_p10  ;;  %p870_p9 = por %p869_p7, %p868_p3 }
  0x46   : > { %p871_p1 = pnand %p870_p9, %p864_p13 }
  0x48   : > { %874 = shalt.err (!%p871_p1)
}
  0x49   : > { %714 = dma.hbm_to_vmem [thread:$0]  (!%p1136_p11), %s1134_s26, 64, %s1140_s30, %s153_s6  }
  0x4a   : > { %s651_s7 = sshll.u32 %s1127_s27, 3  ;;  %s652_s8 = sshll.u32 %s979_s15, 7 }
  0x4b   : > { %s1174_s11 = scalar_lea.hbm %s1297_s1, %s652_s8  ;;  %s174_s23 = scalar_lea.vmem [#allocation5], %s651_s7 }
  0x4c   : > { %s181_s28 = sshll.u32 %s174_s23, 4  ;;  %s171_s22 = scalar_lea.sflag [#allocation6], %s170_s5  ;;  %s182_s28 = int_to_ptr.vmem [resolvable:$true] %s181_s28 }
  0x4d   : > { %s875_s29 = scalar_lea.hbm %s1174_s11, 128  ;;  %s880_s30 = scalar_lea.hbm %s1297_s1, 256 }
  0x4e   : > { %p876_p5 = scmp.ne.s32.totalorder %s1174_s11, %s875_s29  ;;  %p881_p6 = scmp.lt.u32.totalorder %s1174_s11, %s1297_s1 }
  0x4f   : > { %p882_p8 = scmp.lt.u32.totalorder %s880_s30, %s875_s29  ;;  %p884_p13 = scmp.lt.u32.totalorder %s875_s29, %s1174_s11 }
  0x50   : > { %p878_p2 = pnand %p876_p5, %p847_p0 }
  0x51   : > { %p883_p10 = por %p882_p8, %p881_p6 }
  0x52   : > { %p879_p4 = pneg %p878_p2 }
  0x53   : > { %p885_p3 = por %p884_p13, %p883_p10 }
  0x55   : > { %p886_p7 = pnand %p885_p3, %p879_p4 }
  0x57   : > { %889 = shalt.err (!%p886_p7)
}
  0x58   : > { %s890_s5 = scalar_lea.vmem %s182_s28, 128  ;;  %s985_s7 = smov [#allocation5]  }
  0x59   : > { %p891_p9 = scmp.ne.s32.totalorder %s182_s28, %s890_s5  ;;  %s895_s8 = sshll.u32 %s985_s7, 4  ;;  %s896_s8 = int_to_ptr.vmem [resolvable:$false] %s895_s8 }
  0x5a   : > { %s897_s9 = scalar_lea.vmem %s896_s8, 256  ;;  %p898_p2 = scmp.lt.s32.totalorder %s182_s28, %s896_s8 }
  0x5b   : > { %p893_p1 = pnand %p891_p9, %p847_p0  ;;  %p899_p12 = scmp.lt.s32.totalorder %s897_s9, %s890_s5 }
  0x5d   : > { %p894_p5 = pneg %p893_p1  ;;  %p900_p6 = por %p899_p12, %p898_p2 }
  0x5f   : > { %p901_p8 = pnand %p900_p6, %p894_p5 }
  0x61   : > { %904 = shalt.err (!%p901_p8)
}
  0x62   : > { %717 = dma.hbm_to_vmem [thread:$0]  (!%p1136_p11), %s1174_s11, 128, %s182_s28, %s171_s22  }
  0x63   : > { %p1311_p4 = scmp.ne.s32.totalorder %s1306_s20, 0 }
  0x64   : > { %s1200_s10 = sand.u32 (!%p1311_p4), 1, %s971_s13   ;;  %p1312_p0 = scmp.ne.s32.totalorder (!%p1311_p4), %s1304_s18, 0 }
  0x65   : > { %190 = sbr.rel (%p1311_p4) target bundleno = 1256 (0x4e8), region = 32  ;;  %s654_s23 = sshll.u32 (!%p1311_p4), %s1200_s10, 2 }
  0x66   : > { %s193_s29 = scalar_lea.sflag (!%p1311_p4), [#allocation3], %s1200_s10  ;;  %s196_s27 = scalar_lea.vmem (!%p1311_p4), [#allocation2], %s654_s23 }
  0x6c   : > { %950 = dma.done.wait (%p1312_p0), %s193_s29, 64  }
  0x6d   : > { %952 = vsyncadd (%p1312_p0), %s193_s29, 4294967232  ;;  %s201_s20 = sand.u32 1, %s1052_s16   ;;  %s655_s4 = sshll.u32 %s1200_s10, 3 }
  0x6e   : > { %s202_s11 = scalar_lea.sflag [#allocation6], %s201_s20  ;;  %s1212_s28 = scalar_lea.vmem [#allocation5], %s655_s4 }
  0x6f   : > { %954 = dma.done.wait (%p1312_p0), %s202_s11, 128  }
  0x70   : > { %956 = vsyncadd (%p1312_p0), %s202_s11, 4294967168  ;;  %p1313_p12 = scmp.eq.s32.totalorder %s1052_s16, 0 }
  0x72   : > { %958 = dma.done.wait (%p1313_p12), [#allocation6], 832   ;;  %p1314_p11 = pmov %p1313_p12 }
  0x73   : > { %v986_v0 = vmov 10   ;;  %v987_v1 = vmov 8   ;;  %v239_v2 = vld [vmem:[%s196_s27] sm:$0xf]  ;;  %v988_v4 = vmov 11   ;;  %v989_v5 = vmov 9  }
  0x74   : > { %960 = vsyncadd (%p1314_p11), [#allocation6], 4294966464  ;;  %787 = vset.pattern.permute.xlu1 %v986_v0  ;;  %785 = vset.pattern.permute.xlu0 %v987_v1  ;;  %v240_v3 = vunpack.c.l.bf16 %v239_v2  ;;  %v990_v6 = vmov 12   ;;  %v991_v7 = vmov 13   ;;  %v992_v8 = vmov 14   ;;  %v1223_v14 = vld [vmem:[%s1212_s28] sm:$0xff] }
  0x75   : > { %v993_v9 = vmov 0   ;;  %v994_v10 = vmov 15   ;;  %v995_v11 = vmov 3   ;;  %v996_v12 = vmov 1   ;;  %s999_s18 = smov 66   ;;  %v802_v16 = vld [vmem:[#allocation7] sm:$0xff]  }
  0x76   : > { %283 = vperm.xlu1 %787, %v240_v3   ;;  %252 = vperm.xlu0 %785, %v240_v3   ;;  %v997_v13 = vmov 6   ;;  %v998_v15 = vmov 2   ;;  %v1000_v17 = vmov 0.0   ;;  %v1001_v18 = vmov 4   ;;  %v803_v19 = vld [vmem:[#allocation7 + $0x8] sm:$0xff]   ;;  %v804_v21 = vld [vmem:[#allocation7 + $0x10] sm:$0xff]  }
  0x77   : > { %679 = vmatprep.subr.bf16.mxu0 %v1000_v17  ;;  %v1002_v20 = vmov 5   ;;  %v1003_v22 = vmov 7   ;;  %v805_v23 = vld [vmem:[#allocation7 + $0x18] sm:$0xff]   ;;  %v806_v24 = vld [vmem:[#allocation7 + $0x20] sm:$0xff]   ;;  %v807_v25 = vld [vmem:[#allocation7 + $0x28] sm:$0xff]   ;;  %v246_v26 = vlaneseq  ;;  %vm437_vm0 = vcmask 1040384  }
  0x78   : > { %680 = vmatpush3.bf16.msra.mxu0 %v802_v16  ;;  %v808_v49 = vld [vmem:[#allocation7 + $0x30] ss:$0 sps:$4 sm:$0x33]   ;;  %vm438_vm1 = vcmask 1041408   ;;  %v1004_v50 = vmov 65535   ;;  %vm1005_vm2 = vmmov 0  }
  0x79   : > { %681 = vmatprep.subr.bf16.mxu0 %v1000_v17  ;;  %v247_v27 = vshrl.u32 %v246_v26, 7  ;;  %v439_v51 = vsel %vm437_vm0, 4294967295, %v1004_v50  ;;  %693 = vmatprep.mubr.msk.bf16.mxu0 %vm1005_vm2, %v1000_v17  ;;  %s1006_s22 = smov 33   ;;  %vm376_vm3 = vcmask 269312   ;;  %vm378_vm4 = vcmask 539648   ;;  %s1007_s26 = smov 64  }
  0x7a   : > { %788 = vset.pattern.permute.xlu1 %v988_v4  ;;  %786 = vset.pattern.permute.xlu0 %v989_v5  ;;  %v440_v56 = vsel %vm438_vm1, %v439_v51, 0  ;;  %vm433_vm5 = vcmask 809984   ;;  %s1008_s30 = smov 32   ;;  %s1009_s6 = smov 96   ;;  %vm516_vm6 = vcmask 261120  }
  0x7b   : > { %299 = vperm.xlu1 %788, %v240_v3   ;;  %267 = vperm.xlu0 %786, %v240_v3   ;;  %v248_v28 = vsub.s32 0, %v247_v27  ;;  %v262_v29 = vsub.s32 1, %v247_v27  ;;  %v278_v30 = vsub.s32 2, %v247_v27  ;;  %v294_v34 = vsub.s32 3, %v247_v27  ;;  %s668_s25 = sshll.u32 %s1052_s16, 7  ;;  %s236_s5 = scalar_lea.vmem [#allocation8], %s655_s4 }
  0x7c   : > { %682 = vmatpush3.bf16.msra.mxu0 %v803_v19  ;;  %v310_v36 = vsub.s32 4, %v247_v27  ;;  %v326_v40 = vsub.s32 5, %v247_v27  ;;  %v342_v48 = vsub.s32 6, %v247_v27  ;;  %v442_v58 = vand.u32 %v808_v49, %v440_v56  ;;  %s543_s7 = sshll.u32 %s236_s5, 4  ;;  %s1251_s23 = scalar_lea.hbm %s1299_s3, %s668_s25  ;;  %s1253_s7 = int_to_ptr.vmem [resolvable:$true] %s543_s7 }
  0x7d   : > { %683 = vmatprep.subr.bf16.mxu0 %v1000_v17  ;;  %v249_v33 = vrot.slane %v1223_v14, %v248_v28  ;;  %v263_v35 = vrot.slane %v1223_v14, %v262_v29  ;;  %v279_v37 = vrot.slane %v1223_v14, %v278_v30  ;;  %v295_v42 = vrot.slane %v1223_v14, %v294_v34  ;;  %s530_s29 = scalar_lea.sflag [#allocation4], %s1200_s10  ;;  %s905_s16 = scalar_lea.vmem %s1253_s7, 128 }
  0x7e   : > { %v311_v44 = vrot.slane %v1223_v14, %v310_v36  ;;  %v327_v47 = vrot.slane %v1223_v14, %v326_v40  ;;  %v343_v61 = vrot.slane %v1223_v14, %v342_v48  ;;  %v358_v62 = vsub.s32 7, %v247_v27  ;;  %p906_p10 = scmp.ne.s32.totalorder %s1253_s7, %s905_s16  ;;  %p1315_p13 = scmp.ne.s32.totalorder %s1309_s21, 0 }
  0x7f   : > { %789 = vset.pattern.permute.xlu1 %v990_v6  ;;  %790 = vset.pattern.permute.xlu0 %v991_v7  ;;  %s1010_s27 = smov [#allocation8]  }
  0x80   : > { %315 = vperm.xlu1 %789, %v240_v3   ;;  %331 = vperm.xlu0 %790, %v240_v3   ;;  %p907_p3 = pnand %p906_p10, %p1315_p13  ;;  %s909_s20 = sshll.u32 %s1010_s27, 4  ;;  %s910_s20 = int_to_ptr.vmem [resolvable:$false] %s909_s20 }
  0x81   : > { %684 = vmatpush3.bf16.msra.mxu0 %v804_v21  ;;  %s911_s4 = scalar_lea.vmem %s910_s20, 256  ;;  %p912_p9 = scmp.lt.s32.totalorder %s1253_s7, %s910_s20 }
  0x82   : > { %685 = vmatprep.subr.bf16.mxu0 %v1000_v17  ;;  %p908_p7 = pneg %p907_p3  ;;  %p913_p1 = scmp.lt.s32.totalorder %s911_s4, %s905_s16 }
  0x84   : > { %791 = vset.pattern.permute.xlu1 %v992_v8  ;;  %793 = vset.pattern.permute.xlu0 %v993_v9  ;;  %p914_p5 = por %p913_p1, %p912_p9 }
  0x85   : > { %347 = vperm.xlu1 %791, %v240_v3   ;;  %243 = vperm.xlu0 %793, %v240_v3  }
  0x86   : > { %686 = vmatpush3.bf16.msra.mxu0 %v805_v23  ;;  %p915_p2 = pnand %p914_p5, %p908_p7 }
  0x87   : > { %687 = vmatprep.subr.bf16.mxu0 %v1000_v17 }
  0x89   : > { %792 = vset.pattern.permute.xlu1 %v994_v10  ;;  %796 = vset.pattern.permute.xlu0 %v995_v11 }
  0x8a   : > { %363 = vperm.xlu1 %792, %v240_v3   ;;  %289 = vperm.xlu0 %796, %v240_v3  }
  0x8b   : > { %688 = vmatpush3.bf16.msra.mxu0 %v806_v24 }
  0x8c   : > { %689 = vmatprep.subr.bf16.mxu0 %v1000_v17 }
  0x8e   : > { %794 = vset.pattern.permute.xlu1 %v996_v12  ;;  %799 = vset.pattern.permute.xlu0 %v997_v13 }
  0x8f   : > { %257 = vperm.xlu1 %794, %v240_v3   ;;  %337 = vperm.xlu0 %799, %v240_v3  }
  0x90   : > { %690 = vmatpush3.bf16.msra.mxu0 %v807_v25 }
  0x91   : > { %691 = vmatprep.subr.bf16.mxu0 %v1000_v17 }
  0x93   : > { %795 = vset.pattern.permute.xlu1 %v998_v15  ;;  %373 = vrot.lane.b32.xlu0 %v1223_v14, %s999_s18 }
  0x94   : > { %273 = vperm.xlu1 %795, %v240_v3   ;;  %801 = vset.pattern.permute.xlu0 %v994_v10 }
  0x95   : > { %692 = vmatpush3.bf16.msra.mxu0 %v442_v58 }
  0x98   : > { %797 = vset.pattern.permute.xlu1 %v1001_v18 }
  0x99   : > { %305 = vperm.xlu1 %797, %v240_v3  }
  0x9d   : > { %798 = vset.pattern.permute.xlu1 %v1002_v20 }
  0x9e   : > { %321 = vperm.xlu1 %798, %v240_v3  }
  0xa2   : > { %800 = vset.pattern.permute.xlu1 %v1003_v22 }
  0xa3   : > { %353 = vperm.xlu1 %800, %v240_v3   ;;  %v359_v3 = vrot.slane %v1223_v14, %v358_v62 }
  0xf5   : > { %v284_v31 = vpop.permute.xlu1 %283  ;;  %v253_v32 = vpop.permute.xlu0 %252 }
  0xf6   : > { %v255_v41 = vmul.f32 %v253_v32, %v249_v33  ;;  %v286_v45 = vmul.f32 %v284_v31, %v279_v37 }
  0xfa   : > { %v300_v38 = vpop.permute.xlu1 %299  ;;  %v268_v39 = vpop.permute.xlu0 %267 }
  0xfb   : > { %v270_v43 = vmul.f32 %v268_v39, %v263_v35  ;;  %v302_v52 = vmul.f32 %v300_v38, %v295_v42 }
  0xfd   : > { %v271_v46 = vadd.f32 %v270_v43, %v255_v41 }
  0xff   : > { %v287_v53 = vadd.f32 %v286_v45, %v271_v46  ;;  %v316_v54 = vpop.permute.xlu1 %315  ;;  %v332_v55 = vpop.permute.xlu0 %331 }
 0x100   : > { %v318_v57 = vmul.f32 %v316_v54, %v311_v44  ;;  %v334_v60 = vmul.f32 %v332_v55, %v327_v47 }
 0x101   : > { %v303_v59 = vadd.f32 %v302_v52, %v287_v53 }
 0x103   : > { %v319_v63 = vadd.f32 %v318_v57, %v303_v59 }
 0x104   : > { %v348_v0 = vpop.permute.xlu1 %347  ;;  %v244_v7 = vpop.permute.xlu0 %243 }
 0x105   : > { %v335_v1 = vadd.f32 %v334_v60, %v319_v63  ;;  %v350_v2 = vmul.f32 %v348_v0, %v343_v61  ;;  %v250_v9 = vmul.f32 %v249_v33, %v244_v7 }
 0x107   : > { %v351_v5 = vadd.f32 %v350_v2, %v335_v1 }
 0x109   : > { %v364_v4 = vpop.permute.xlu1 %363  ;;  %v290_v13 = vpop.permute.xlu0 %289 }
 0x10a   : > { %v366_v6 = vmul.f32 %v364_v4, %v359_v3  ;;  %v296_v18 = vmul.f32 %v295_v42, %v290_v13 }
 0x10c   : > { %v367_v8 = vadd.f32 %v366_v6, %v351_v5 }
 0x10e   : > { %369 = vrot.lane.b32.xlu1 %v367_v8, %s1006_s22  ;;  %v258_v10 = vpop.permute.xlu1 %257  ;;  %v338_v23 = vpop.permute.xlu0 %337 }
 0x10f   : > { %v264_v11 = vmul.f32 %v263_v35, %v258_v10  ;;  %v344_v26 = vmul.f32 %v343_v61, %v338_v23 }
 0x111   : > { %v265_v12 = vadd.f32 %v264_v11, %v250_v9 }
 0x112   : > { %v374_v32 = vpop.permute.xlu0 %373 }
 0x113   : > { %v274_v15 = vpop.permute.xlu1 %273 }
 0x114   : > { %v280_v16 = vmul.f32 %v279_v37, %v274_v15 }
 0x116   : > { %v281_v17 = vadd.f32 %v280_v16, %v265_v12 }
 0x118   : > { %v306_v19 = vpop.permute.xlu1 %305  ;;  %v297_v20 = vadd.f32 %v296_v18, %v281_v17 }
 0x119   : > { %v312_v21 = vmul.f32 %v311_v44, %v306_v19 }
 0x11b   : > { %v313_v22 = vadd.f32 %v312_v21, %v297_v20 }
 0x11d   : > { %v322_v24 = vpop.permute.xlu1 %321 }
 0x11e   : > { %v328_v25 = vmul.f32 %v327_v47, %v322_v24 }
 0x120   : > { %v329_v27 = vadd.f32 %v328_v25, %v313_v22 }
 0x122   : > { %v345_v28 = vadd.f32 %v344_v26, %v329_v27  ;;  %v354_v29 = vpop.permute.xlu1 %353 }
 0x123   : > { %v360_v30 = vmul.f32 %v359_v3, %v354_v29 }
 0x125   : > { %v361_v31 = vadd.f32 %v360_v30, %v345_v28 }
 0x180   : > { %v370_v33 = vpop.permute.xlu1 %369 }
 0x181   : > { %v377_v34 = vsel %vm376_vm3, %v361_v31, %v370_v33 }
 0x182   : > { %v379_v35 = vsel %vm378_vm4, %v377_v34, %v374_v32 }
 0x183   : > { %v380_v36 = vpack.c.bf16 %v379_v35, %v379_v35 }
 0x185   : > { %694 = vmatmul.mubr.msk.bf16.vlgmr.msra.gmra.mrb[0].mxu0 %vm433_vm5, %v380_v36 }
 0x258   : > { %v478_v37 = vpop.f32.mrb[0].mxu0 }
 0x259   : > { %495 = vrot.lane.b32.xlu0 %v478_v37, %s1007_s26  ;;  %491 = vrot.lane.b32.xlu1 %v478_v37, %s1008_s30  ;;  %v695_v38 = vpop.f32.mrb[1].mxu0  ;;  %v666_v41 = vmul.f32 -1.442695, %v478_v37 }
 0x25a   : > { %v481_v39 = vpop.f32.mrb[2].mxu0 }
 0x25b   : > { %v696_v40 = vpop.f32.mrb[3].mxu0  ;;  %809 = vpow2.f32 %v666_v41 }
 0x25d   : > { %501 = vrot.lane.b32.xlu1 %v1223_v14, %s1008_s30 }
 0x265   : > { %v810_v42 = vpop.eup %809 }
 0x266   : > { %v487_v43 = vadd.f32 1.0, %v810_v42 }
 0x268   : > { %811 = vrcp.f32 %v487_v43 }
 0x272   : > { %v812_v44 = vpop.eup %811 }
 0x273   : > { %v500_v51 = vsub.f32 1.0, %v812_v44 }
 0x2cb   : > { %v492_v45 = vpop.permute.xlu1 %491  ;;  %v496_v47 = vpop.permute.xlu0 %495 }
 0x2cc   : > { %v494_v46 = vmul.f32 %v812_v44, %v492_v45 }
 0x2ce   : > { %v498_v48 = vadd.f32 %v496_v47, %v494_v46 }
 0x2cf   : > { %v502_v50 = vpop.permute.xlu1 %501 }
 0x2d0   : > { %813 = vtanh.f32 %v498_v48  ;;  %v504_v53 = vmul.f32 %v502_v50, %v500_v51 }
 0x2da   : > { %v814_v49 = vpop.eup %813 }
 0x2db   : > { %506 = vrot.lane.b32.xlu0 %v814_v49, %s1008_s30 }
 0x34d   : > { %v507_v52 = vpop.permute.xlu0 %506 }
 0x34e   : > { %v509_v54 = vmul.f32 %v812_v44, %v507_v52 }
 0x350   : > { %v510_v55 = vadd.f32 %v509_v54, %v504_v53 }
 0x352   : > { %v511_v56 = vmul.f32 %v510_v55, %v510_v55 }
 0x354   : > { %513 = vrot.lane.b32.xlu1 %v511_v56, %s1009_s6 }
 0x3c6   : > { %v514_v57 = vpop.permute.xlu1 %513 }
 0x3c7   : > { %v517_v58 = vsel %vm516_vm6, %v514_v57, 0.0 }
 0x3c8   : > { %518 = vadd.xlane.f32.xlu0 %v517_v58 }
 0x455   : > { %v519_v59 = vpop.xlane.xlu0 %518 }
 0x456   : > { %v520_v60 = vmax.f32 %v519_v59, 1e-24 }
 0x458   : > { %815 = vrsqrt.f32 %v520_v60 }
 0x462   : > { %v816_v61 = vpop.eup %815 }
 0x463   : > { %v522_v62 = vmul.f32 %v816_v61, %v510_v55 }
 0x465   : > { %524 = vrot.lane.b32.xlu1 %v522_v62, %s1009_s6 }
 0x4d7   : > { %v525_v63 = vpop.permute.xlu1 %524 }
 0x4d8   : > { %v527_v0 = vadd.f32 %v525_v63, %v1223_v14 }
 0x4da   : > { %528 = vst.msk [vmem:[%s236_s5] sm:$0xff] %vm516_vm6, %v527_v0 }
 0x4db   : > { %918 = shalt.err (!%p915_p2)
}
 0x4dc   : > { %s919_s10 = scalar_lea.hbm %s1251_s23, 128  ;;  %s923_s18 = scalar_lea.hbm %s1299_s3, 256 }
 0x4dd   : > { %p920_p6 = scmp.ne.s32.totalorder %s1251_s23, %s919_s10  ;;  %p924_p0 = scmp.lt.u32.totalorder %s1251_s23, %s1299_s3 }
 0x4de   : > { %p925_p12 = scmp.lt.u32.totalorder %s923_s18, %s919_s10  ;;  %p927_p10 = scmp.lt.u32.totalorder %s919_s10, %s1251_s23 }
 0x4df   : > { %p921_p8 = pnand %p920_p6, %p1315_p13 }
 0x4e0   : > { %p926_p11 = por %p925_p12, %p924_p0 }
 0x4e1   : > { %p922_p4 = pneg %p921_p8 }
 0x4e2   : > { %p928_p3 = por %p927_p10, %p926_p11 }
 0x4e4   : > { %p929_p7 = pnand %p928_p3, %p922_p4 }
 0x4e6   : > { %932 = shalt.err (!%p929_p7)
}
 0x4e7   : > { %705 = dma.vmem_to_hbm [thread:$0]  (%p1315_p13), %s1253_s7, 128, %s1251_s23, %s530_s29  }
 0x4e8 PF: > { %s555_s30 = sand.u32 1, %s967_s12   ;;  %p1316_p9 = scmp.ne.s32.totalorder %s1305_s19, 0 }
 0x4e9   : > { %p1317_p1 = scmp.ge.s32.totalorder %s979_s15, 2  ;;  %s556_s6 = scalar_lea.sflag [#allocation4], %s555_s30 }
 0x4eb   : > { %p719_p5 = pnand %p1317_p1, %p1316_p9 }
 0x4ed   : > { %962 = dma.done.wait (!%p719_p5), %s556_s6, 128  }
 0x4ee   : > { %964 = vsyncadd (!%p719_p5), %s556_s6, 4294967168  ;;  %p19_p2 = scmp.ge.s32.totalorder %s1087_s24, 4   ;;  %s1318_s12 = smov %s971_s13 }
 0x4ef   : > { %s1319_s13 = smov %s975_s14  ;;  %s1320_s14 = smov %s1118_s17 }
 0x4f0   : > { %s1321_s15 = smov %s1087_s24  ;;  %21 = sbr.rel (!%p19_p2) target bundleno = 7 (0x7), region = 94 }
 0x4f7   :  { %561 = vsyncpa [#allocation3], 1 }
 0x4f8   :  { %563 = vsyncpa [#allocation3 + $0x1], 1 }
 0x4f9   :  { %564 = vsyncpa [#allocation6], 1 }
 0x4fa   :  { %566 = vsyncpa [#allocation6 + $0x1], 1 }
 0x4fb   :  { %567 = vsyncpa [#allocation4], 1 }
 0x4fc   :  { %569 = vsyncpa [#allocation4 + $0x1], 1 }

</bundles_post_ra>
